<compile_context>
chip_gen: v7x
topology: tpu7x:2x2x1
jax: 0.10.0
libtpu: 0.0.40
codegen_flags: <defaults>
</compile_context>

<pallas_src>
import jax
import jax.numpy as jnp
from jax.experimental import pallas as pl
from jax.experimental.pallas import tpu as pltpu

# ---- model hyperparameters (small demo sizes consistent with the module) ----
DIM = 32          # embedding dim (PyTorch default 384, shrunk for the demo)
N_HEADS = 4       # PyTorch default 12, shrunk; DIM % N_HEADS == 0
HEAD_DIM = DIM // N_HEADS
MLP_RATIO = 3
HIDDEN = DIM * MLP_RATIO
SCALE = float(HEAD_DIM) ** 0.5
EPS = 1e-5        # nn.LayerNorm default eps

B = 2             # n_samples
T = 8             # n_tokens (n_patches + 1)


def _layernorm(x, gamma, beta):
    mu = jnp.mean(x, axis=-1, keepdims=True)
    var = jnp.mean((x - mu) ** 2, axis=-1, keepdims=True)
    return (x - mu) * jax.lax.rsqrt(var + EPS) * gamma + beta


def transformer_block_kernel(
    x_ref,
    ln1_g_ref, ln1_b_ref,
    wqkv_ref, bqkv_ref,
    wproj_ref, bproj_ref,
    ln2_g_ref, ln2_b_ref,
    w1_ref, b1_ref, w2_ref, b2_ref,
    out_ref,
):
    # One batch element per grid step: x is (T, D).
    x = x_ref[...]

    # ---- norm1 ----
    xn = _layernorm(x, ln1_g_ref[...], ln1_b_ref[...])

    # ---- fused QKV projection: one wide MXU pass (96/128 lanes vs 8/128) ----
    # 1/sqrt(head_dim) is already folded into the Q columns / Q bias.
    qkv = jnp.dot(xn, wqkv_ref[...],
                  preferred_element_type=jnp.float32) + bqkv_ref[...]   # (T, 3D)

    # ---- multi-head attention ----
    # TODO(synk): at H=12 move heads onto a grid axis / lax.fori_loop instead of
    # a static Python unroll.
    o_heads = []
    for h in range(N_HEADS):
        q = qkv[:, h * HEAD_DIM:(h + 1) * HEAD_DIM]                       # (T, hd)
        k = qkv[:, DIM + h * HEAD_DIM:DIM + (h + 1) * HEAD_DIM]           # (T, hd)
        v = qkv[:, 2 * DIM + h * HEAD_DIM:2 * DIM + (h + 1) * HEAD_DIM]   # (T, hd)
        # q @ k^T by contracting head_dim on both operands (no k.T in source).
        # TODO(synk): confirm via pl.lower_as_mlir that Mosaic emits no vxpose
        # here at real sizes; if it does, produce k pre-transposed instead.
        s = jax.lax.dot_general(q, k, (((1,), (1,)), ((), ())),
                                preferred_element_type=jnp.float32)       # (T, T)
        s = s - jnp.max(s, axis=-1, keepdims=True)
        p = jnp.exp(s)
        p = p / jnp.sum(p, axis=-1, keepdims=True)   # exact divide (accuracy > slot savings here)
        o_heads.append(jnp.dot(p, v, preferred_element_type=jnp.float32))  # (T, hd)

    # Heads occupy adjacent lanes: one concat, then a single (T,D)@(D,D)
    # output projection instead of 4 accumulated K=8 dots.
    o = jnp.concatenate(o_heads, axis=-1)                                  # (T, D)
    attn = jnp.dot(o, wproj_ref[...],
                   preferred_element_type=jnp.float32) + bproj_ref[...]

    # residual from the *normalized* input — matches the PyTorch module as written
    x1 = xn + attn

    # ---- norm2 + MLP + residual ----
    x2 = _layernorm(x1, ln2_g_ref[...], ln2_b_ref[...])
    h1 = jnp.maximum(
        jnp.dot(x2, w1_ref[...], preferred_element_type=jnp.float32) + b1_ref[...], 0.0)
    h2 = jnp.dot(h1, w2_ref[...], preferred_element_type=jnp.float32) + b2_ref[...]
    out_ref[...] = x2 + h2


def prepare_params(torch_params):
    """Rearrange PyTorch-layout weights into the kernel layout (all 2-D)."""
    (ln1_g, ln1_b, Wqkv, bqkv, Wproj, bproj,
     ln2_g, ln2_b, W1, b1, W2, b2) = torch_params

    # nn.Linear weight is (out, in); fused QKV kernel weight is (D, 3D) with
    # columns ordered (q|k|v) x head x head_dim — exactly the order the module's
    # qkv.reshape(n, t, 3, H, hd) implies, so per-head slices are contiguous.
    wqkv_t = Wqkv.T                                        # (D, 3D)
    bqkv_row = bqkv.reshape(1, 3 * DIM)

    # fold 1/sqrt(head_dim) into the query projection (first D columns)
    scale_cols = jnp.concatenate(
        [jnp.full((DIM,), 1.0 / SCALE, jnp.float32),
         jnp.ones((2 * DIM,), jnp.float32)])
    wqkv_t = wqkv_t * scale_cols[None, :]
    bqkv_row = bqkv_row * scale_cols[None, :]

    return (
        ln1_g.reshape(1, DIM), ln1_b.reshape(1, DIM),
        wqkv_t, bqkv_row,                                  # (D, 3D), (1, 3D)
        Wproj.T, bproj.reshape(1, DIM),                    # (D, D),  (1, D)
        ln2_g.reshape(1, DIM), ln2_b.reshape(1, DIM),
        W1.T, b1.reshape(1, HIDDEN),                       # (D, HIDDEN), (1, HIDDEN)
        W2.T, b2.reshape(1, DIM),                          # (HIDDEN, D), (1, D)
    )


@jax.jit
def transformer_block(x, kernel_params):
    # One grid step per batch element; weights/biases use constant index maps
    # (full-array blocks, resident in VMEM across steps).
    x_spec = pl.BlockSpec((None, T, DIM), lambda b: (b, 0, 0))
    const_map = lambda b: (0, 0)
    param_specs = [pl.BlockSpec(p.shape, const_map) for p in kernel_params]

    return pl.pallas_call(
        transformer_block_kernel,
        out_shape=jax.ShapeDtypeStruct((B, T, DIM), jnp.float32),
        grid=(B,),
        in_specs=[x_spec, *param_specs],
        out_specs=pl.BlockSpec((None, T, DIM), lambda b: (b, 0, 0)),
        compiler_params=pltpu.CompilerParams(
            dimension_semantics=("parallel",),   # v7x: shard batches across the 2 TCs
        ),
    )(x, *kernel_params)


# ------------------- pure-JAX reference (PyTorch semantics) -------------------
def reference(x, torch_params):
    (ln1_g, ln1_b, Wqkv, bqkv, Wproj, bproj,
     ln2_g, ln2_b, W1, b1, W2, b2) = torch_params
    xn = _layernorm(x, ln1_g, ln1_b)
    qkv = xn @ Wqkv.T + bqkv                                    # (B, T, 3D)
    qkv = qkv.reshape(B, T, 3, N_HEADS, HEAD_DIM)
    q, k, v = qkv[:, :, 0], qkv[:, :, 1], qkv[:, :, 2]
    q = q.transpose(0, 2, 1, 3)
    k = k.transpose(0, 2, 1, 3)
    v = v.transpose(0, 2, 1, 3)
    s = jnp.einsum("bhqd,bhkd->bhqk", q, k) / SCALE
    p = jax.nn.softmax(s, axis=-1)
    o = jnp.einsum("bhqk,bhkd->bhqd", p, v)
    o = o.transpose(0, 2, 1, 3).reshape(B, T, DIM)
    proj = o @ Wproj.T + bproj
    x1 = xn + proj
    x2 = _layernorm(x1, ln2_g, ln2_b)
    h1 = jnp.maximum(x2 @ W1.T + b1, 0.0)
    h2 = h1 @ W2.T + b2
    return x2 + h2


def init_torch_params(key):
    ks = jax.random.split(key, 8)
    s = 0.05
    # PyTorch Linear convention: weight is (out, in)
    Wqkv = jax.random.normal(ks[0], (3 * DIM, DIM)) * s
    bqkv = jax.random.normal(ks[1], (3 * DIM,)) * s
    Wproj = jax.random.normal(ks[2], (DIM, DIM)) * s
    bproj = jax.random.normal(ks[3], (DIM,)) * s
    W1 = jax.random.normal(ks[4], (HIDDEN, DIM)) * s
    b1 = jax.random.normal(ks[5], (HIDDEN,)) * s
    W2 = jax.random.normal(ks[6], (DIM, HIDDEN)) * s
    b2 = jax.random.normal(ks[7], (DIM,)) * s
    ln1_g = jnp.ones((DIM,), jnp.float32)
    ln1_b = jnp.zeros((DIM,), jnp.float32)
    ln2_g = jnp.ones((DIM,), jnp.float32)
    ln2_b = jnp.zeros((DIM,), jnp.float32)
    return tuple(p.astype(jnp.float32) for p in
                 (ln1_g, ln1_b, Wqkv, bqkv, Wproj, bproj,
                  ln2_g, ln2_b, W1, b1, W2, b2))


if __name__ == "__main__":
    key = jax.random.PRNGKey(0)
    kx, kp = jax.random.split(key)
    x = jax.random.normal(kx, (B, T, DIM), dtype=jnp.float32)
    torch_params = init_torch_params(kp)
    kernel_params = prepare_params(torch_params)

    out = jax.block_until_ready(transformer_block(x, kernel_params))
    ref = jax.block_until_ready(reference(x, torch_params))

    assert out.shape == (B, T, DIM)
    err = float(jnp.max(jnp.abs(out - ref)))
    # Exact softmax normalization restores tight accuracy (only f32
    # accumulation-order differences remain).
    assert jnp.allclose(out, ref, atol=1e-4, rtol=1e-4), f"max abs err {err}"
    print("KERNEL_OK")
</pallas_src>

<mosaic_0001>
module attributes {stable_mosaic.version = 11 : i64} {
  func.func @transformer_block_kernel(%arg0: i32, %arg1: memref<1x8x32xf32, #tpu.memory_space<vmem>>, %arg2: memref<1x32xf32, #tpu.memory_space<vmem>>, %arg3: memref<1x32xf32, #tpu.memory_space<vmem>>, %arg4: memref<32x96xf32, #tpu.memory_space<vmem>>, %arg5: memref<1x96xf32, #tpu.memory_space<vmem>>, %arg6: memref<32x32xf32, #tpu.memory_space<vmem>>, %arg7: memref<1x32xf32, #tpu.memory_space<vmem>>, %arg8: memref<1x32xf32, #tpu.memory_space<vmem>>, %arg9: memref<1x32xf32, #tpu.memory_space<vmem>>, %arg10: memref<32x96xf32, #tpu.memory_space<vmem>>, %arg11: memref<1x96xf32, #tpu.memory_space<vmem>>, %arg12: memref<96x32xf32, #tpu.memory_space<vmem>>, %arg13: memref<1x32xf32, #tpu.memory_space<vmem>>, %arg14: memref<1x8x32xf32, #tpu.memory_space<vmem>>) attributes {dimension_semantics = [#tpu.dimension_semantics<parallel>], iteration_bounds = array<i64: 2>, scalar_prefetch = 0 : i64, scratch_operands = 0 : i64, tpu.core_type = #tpu.core_type<tc>, window_params = [{transform_indices = @transform_0, window_bounds = array<i64: 1, 8, 32>}, {pipeline_mode = #tpu.pipeline_mode<synchronous>, transform_indices = @transform_1, window_bounds = array<i64: 1, 32>}, {pipeline_mode = #tpu.pipeline_mode<synchronous>, transform_indices = @transform_2, window_bounds = array<i64: 1, 32>}, {pipeline_mode = #tpu.pipeline_mode<synchronous>, transform_indices = @transform_3, window_bounds = array<i64: 32, 96>}, {pipeline_mode = #tpu.pipeline_mode<synchronous>, transform_indices = @transform_4, window_bounds = array<i64: 1, 96>}, {pipeline_mode = #tpu.pipeline_mode<synchronous>, transform_indices = @transform_5, window_bounds = array<i64: 32, 32>}, {pipeline_mode = #tpu.pipeline_mode<synchronous>, transform_indices = @transform_6, window_bounds = array<i64: 1, 32>}, {pipeline_mode = #tpu.pipeline_mode<synchronous>, transform_indices = @transform_7, window_bounds = array<i64: 1, 32>}, {pipeline_mode = #tpu.pipeline_mode<synchronous>, transform_indices = @transform_8, window_bounds = array<i64: 1, 32>}, {pipeline_mode = #tpu.pipeline_mode<synchronous>, transform_indices = @transform_9, window_bounds = array<i64: 32, 96>}, {pipeline_mode = #tpu.pipeline_mode<synchronous>, transform_indices = @transform_10, window_bounds = array<i64: 1, 96>}, {pipeline_mode = #tpu.pipeline_mode<synchronous>, transform_indices = @transform_11, window_bounds = array<i64: 96, 32>}, {pipeline_mode = #tpu.pipeline_mode<synchronous>, transform_indices = @transform_12, window_bounds = array<i64: 1, 32>}, {transform_indices = @transform_13, window_bounds = array<i64: 1, 8, 32>}]} {
    %c0 = arith.constant 0 : index
    %c0_0 = arith.constant 0 : index
    %c0_1 = arith.constant 0 : index
    %0 = vector.load %arg1[%c0, %c0_0, %c0_1] : memref<1x8x32xf32, #tpu.memory_space<vmem>>, vector<1x8x32xf32>
    %1 = vector.shape_cast %0 : vector<1x8x32xf32> to vector<8x32xf32>
    %c0_2 = arith.constant 0 : index
    %c0_3 = arith.constant 0 : index
    %2 = vector.load %arg2[%c0_2, %c0_3] : memref<1x32xf32, #tpu.memory_space<vmem>>, vector<1x32xf32>
    %c0_4 = arith.constant 0 : index
    %c0_5 = arith.constant 0 : index
    %3 = vector.load %arg3[%c0_4, %c0_5] : memref<1x32xf32, #tpu.memory_space<vmem>>, vector<1x32xf32>
    %cst = arith.constant dense<0.000000e+00> : vector<8xf32>
    %4 = vector.multi_reduction <add>, %1, %cst [1] : vector<8x32xf32> to vector<8xf32>
    %5 = vector.shape_cast %4 : vector<8xf32> to vector<8x1xf32>
    %cst_6 = arith.constant 3.200000e+01 : f32
    %6 = vector.broadcast %cst_6 : f32 to vector<8x1xf32>
    %7 = arith.divf %5, %6 : vector<8x1xf32>
    %8 = vector.broadcast %7 : vector<8x1xf32> to vector<8x32xf32>
    %9 = arith.subf %1, %8 : vector<8x32xf32>
    %10 = arith.mulf %9, %9 : vector<8x32xf32>
    %cst_7 = arith.constant dense<0.000000e+00> : vector<8xf32>
    %11 = vector.multi_reduction <add>, %10, %cst_7 [1] : vector<8x32xf32> to vector<8xf32>
    %12 = vector.shape_cast %11 : vector<8xf32> to vector<8x1xf32>
    %cst_8 = arith.constant 3.200000e+01 : f32
    %13 = vector.broadcast %cst_8 : f32 to vector<8x1xf32>
    %14 = arith.divf %12, %13 : vector<8x1xf32>
    %15 = vector.broadcast %7 : vector<8x1xf32> to vector<8x32xf32>
    %16 = arith.subf %1, %15 : vector<8x32xf32>
    %cst_9 = arith.constant 9.99999974E-6 : f32
    %17 = vector.broadcast %cst_9 : f32 to vector<8x1xf32>
    %18 = arith.addf %14, %17 : vector<8x1xf32>
    %19 = math.rsqrt %18 : vector<8x1xf32>
    %20 = vector.broadcast %19 : vector<8x1xf32> to vector<8x32xf32>
    %21 = arith.mulf %16, %20 : vector<8x32xf32>
    %22 = vector.broadcast %2 : vector<1x32xf32> to vector<8x32xf32>
    %23 = arith.mulf %21, %22 : vector<8x32xf32>
    %24 = vector.broadcast %3 : vector<1x32xf32> to vector<8x32xf32>
    %25 = arith.addf %23, %24 : vector<8x32xf32>
    %c0_10 = arith.constant 0 : index
    %c0_11 = arith.constant 0 : index
    %26 = vector.load %arg4[%c0_10, %c0_11] : memref<32x96xf32, #tpu.memory_space<vmem>>, vector<32x96xf32>
    %cst_12 = arith.constant dense<0.000000e+00> : vector<8x96xf32>
    %27 = tpu.matmul %25, %26, %cst_12 {dimension_numbers = #tpu.dot_dimension_numbers<[1], [0], [0], [1], [0, 0, 1, 1], [], []>} : vector<8x32xf32>, vector<32x96xf32>, vector<8x96xf32> -> vector<8x96xf32>
    %c0_13 = arith.constant 0 : index
    %c0_14 = arith.constant 0 : index
    %28 = vector.load %arg5[%c0_13, %c0_14] : memref<1x96xf32, #tpu.memory_space<vmem>>, vector<1x96xf32>
    %29 = vector.broadcast %28 : vector<1x96xf32> to vector<8x96xf32>
    %30 = arith.addf %27, %29 : vector<8x96xf32>
    %31 = vector.extract_strided_slice %30 {offsets = [0, 0], sizes = [8, 8], strides = [1, 1]} : vector<8x96xf32> to vector<8x8xf32>
    %32 = vector.extract_strided_slice %30 {offsets = [0, 32], sizes = [8, 8], strides = [1, 1]} : vector<8x96xf32> to vector<8x8xf32>
    %33 = vector.extract_strided_slice %30 {offsets = [0, 64], sizes = [8, 8], strides = [1, 1]} : vector<8x96xf32> to vector<8x8xf32>
    %cst_15 = arith.constant dense<0.000000e+00> : vector<8x8xf32>
    %34 = tpu.matmul %31, %32, %cst_15 {dimension_numbers = #tpu.dot_dimension_numbers<[1], [1], [0], [0], [0, 0, 1, 0], [], []>} : vector<8x8xf32>, vector<8x8xf32>, vector<8x8xf32> -> vector<8x8xf32>
    %cst_16 = arith.constant dense<0xFF800000> : vector<8xf32>
    %35 = vector.multi_reduction <maximumf>, %34, %cst_16 [1] : vector<8x8xf32> to vector<8xf32>
    %36 = vector.shape_cast %35 : vector<8xf32> to vector<8x1xf32>
    %37 = vector.broadcast %36 : vector<8x1xf32> to vector<8x8xf32>
    %38 = arith.subf %34, %37 : vector<8x8xf32>
    %39 = math.exp %38 : vector<8x8xf32>
    %cst_17 = arith.constant dense<0.000000e+00> : vector<8xf32>
    %40 = vector.multi_reduction <add>, %39, %cst_17 [1] : vector<8x8xf32> to vector<8xf32>
    %41 = vector.shape_cast %40 : vector<8xf32> to vector<8x1xf32>
    %42 = vector.broadcast %41 : vector<8x1xf32> to vector<8x8xf32>
    %43 = arith.divf %39, %42 : vector<8x8xf32>
    %cst_18 = arith.constant dense<0.000000e+00> : vector<8x8xf32>
    %44 = tpu.matmul %43, %33, %cst_18 {dimension_numbers = #tpu.dot_dimension_numbers<[1], [0], [0], [1], [0, 0, 1, 1], [], []>} : vector<8x8xf32>, vector<8x8xf32>, vector<8x8xf32> -> vector<8x8xf32>
    %45 = vector.extract_strided_slice %30 {offsets = [0, 8], sizes = [8, 8], strides = [1, 1]} : vector<8x96xf32> to vector<8x8xf32>
    %46 = vector.extract_strided_slice %30 {offsets = [0, 40], sizes = [8, 8], strides = [1, 1]} : vector<8x96xf32> to vector<8x8xf32>
    %47 = vector.extract_strided_slice %30 {offsets = [0, 72], sizes = [8, 8], strides = [1, 1]} : vector<8x96xf32> to vector<8x8xf32>
    %cst_19 = arith.constant dense<0.000000e+00> : vector<8x8xf32>
    %48 = tpu.matmul %45, %46, %cst_19 {dimension_numbers = #tpu.dot_dimension_numbers<[1], [1], [0], [0], [0, 0, 1, 0], [], []>} : vector<8x8xf32>, vector<8x8xf32>, vector<8x8xf32> -> vector<8x8xf32>
    %cst_20 = arith.constant dense<0xFF800000> : vector<8xf32>
    %49 = vector.multi_reduction <maximumf>, %48, %cst_20 [1] : vector<8x8xf32> to vector<8xf32>
    %50 = vector.shape_cast %49 : vector<8xf32> to vector<8x1xf32>
    %51 = vector.broadcast %50 : vector<8x1xf32> to vector<8x8xf32>
    %52 = arith.subf %48, %51 : vector<8x8xf32>
    %53 = math.exp %52 : vector<8x8xf32>
    %cst_21 = arith.constant dense<0.000000e+00> : vector<8xf32>
    %54 = vector.multi_reduction <add>, %53, %cst_21 [1] : vector<8x8xf32> to vector<8xf32>
    %55 = vector.shape_cast %54 : vector<8xf32> to vector<8x1xf32>
    %56 = vector.broadcast %55 : vector<8x1xf32> to vector<8x8xf32>
    %57 = arith.divf %53, %56 : vector<8x8xf32>
    %cst_22 = arith.constant dense<0.000000e+00> : vector<8x8xf32>
    %58 = tpu.matmul %57, %47, %cst_22 {dimension_numbers = #tpu.dot_dimension_numbers<[1], [0], [0], [1], [0, 0, 1, 1], [], []>} : vector<8x8xf32>, vector<8x8xf32>, vector<8x8xf32> -> vector<8x8xf32>
    %59 = vector.extract_strided_slice %30 {offsets = [0, 16], sizes = [8, 8], strides = [1, 1]} : vector<8x96xf32> to vector<8x8xf32>
    %60 = vector.extract_strided_slice %30 {offsets = [0, 48], sizes = [8, 8], strides = [1, 1]} : vector<8x96xf32> to vector<8x8xf32>
    %61 = vector.extract_strided_slice %30 {offsets = [0, 80], sizes = [8, 8], strides = [1, 1]} : vector<8x96xf32> to vector<8x8xf32>
    %cst_23 = arith.constant dense<0.000000e+00> : vector<8x8xf32>
    %62 = tpu.matmul %59, %60, %cst_23 {dimension_numbers = #tpu.dot_dimension_numbers<[1], [1], [0], [0], [0, 0, 1, 0], [], []>} : vector<8x8xf32>, vector<8x8xf32>, vector<8x8xf32> -> vector<8x8xf32>
    %cst_24 = arith.constant dense<0xFF800000> : vector<8xf32>
    %63 = vector.multi_reduction <maximumf>, %62, %cst_24 [1] : vector<8x8xf32> to vector<8xf32>
    %64 = vector.shape_cast %63 : vector<8xf32> to vector<8x1xf32>
    %65 = vector.broadcast %64 : vector<8x1xf32> to vector<8x8xf32>
    %66 = arith.subf %62, %65 : vector<8x8xf32>
    %67 = math.exp %66 : vector<8x8xf32>
    %cst_25 = arith.constant dense<0.000000e+00> : vector<8xf32>
    %68 = vector.multi_reduction <add>, %67, %cst_25 [1] : vector<8x8xf32> to vector<8xf32>
    %69 = vector.shape_cast %68 : vector<8xf32> to vector<8x1xf32>
    %70 = vector.broadcast %69 : vector<8x1xf32> to vector<8x8xf32>
    %71 = arith.divf %67, %70 : vector<8x8xf32>
    %cst_26 = arith.constant dense<0.000000e+00> : vector<8x8xf32>
    %72 = tpu.matmul %71, %61, %cst_26 {dimension_numbers = #tpu.dot_dimension_numbers<[1], [0], [0], [1], [0, 0, 1, 1], [], []>} : vector<8x8xf32>, vector<8x8xf32>, vector<8x8xf32> -> vector<8x8xf32>
    %73 = vector.extract_strided_slice %30 {offsets = [0, 24], sizes = [8, 8], strides = [1, 1]} : vector<8x96xf32> to vector<8x8xf32>
    %74 = vector.extract_strided_slice %30 {offsets = [0, 56], sizes = [8, 8], strides = [1, 1]} : vector<8x96xf32> to vector<8x8xf32>
    %75 = vector.extract_strided_slice %30 {offsets = [0, 88], sizes = [8, 8], strides = [1, 1]} : vector<8x96xf32> to vector<8x8xf32>
    %cst_27 = arith.constant dense<0.000000e+00> : vector<8x8xf32>
    %76 = tpu.matmul %73, %74, %cst_27 {dimension_numbers = #tpu.dot_dimension_numbers<[1], [1], [0], [0], [0, 0, 1, 0], [], []>} : vector<8x8xf32>, vector<8x8xf32>, vector<8x8xf32> -> vector<8x8xf32>
    %cst_28 = arith.constant dense<0xFF800000> : vector<8xf32>
    %77 = vector.multi_reduction <maximumf>, %76, %cst_28 [1] : vector<8x8xf32> to vector<8xf32>
    %78 = vector.shape_cast %77 : vector<8xf32> to vector<8x1xf32>
    %79 = vector.broadcast %78 : vector<8x1xf32> to vector<8x8xf32>
    %80 = arith.subf %76, %79 : vector<8x8xf32>
    %81 = math.exp %80 : vector<8x8xf32>
    %cst_29 = arith.constant dense<0.000000e+00> : vector<8xf32>
    %82 = vector.multi_reduction <add>, %81, %cst_29 [1] : vector<8x8xf32> to vector<8xf32>
    %83 = vector.shape_cast %82 : vector<8xf32> to vector<8x1xf32>
    %84 = vector.broadcast %83 : vector<8x1xf32> to vector<8x8xf32>
    %85 = arith.divf %81, %84 : vector<8x8xf32>
    %cst_30 = arith.constant dense<0.000000e+00> : vector<8x8xf32>
    %86 = tpu.matmul %85, %75, %cst_30 {dimension_numbers = #tpu.dot_dimension_numbers<[1], [0], [0], [1], [0, 0, 1, 1], [], []>} : vector<8x8xf32>, vector<8x8xf32>, vector<8x8xf32> -> vector<8x8xf32>
    %87 = tpu.concatenate %44, %58, %72, %86 in 1 : vector<8x8xf32>, vector<8x8xf32>, vector<8x8xf32>, vector<8x8xf32> -> vector<8x32xf32>
    %c0_31 = arith.constant 0 : index
    %c0_32 = arith.constant 0 : index
    %88 = vector.load %arg6[%c0_31, %c0_32] : memref<32x32xf32, #tpu.memory_space<vmem>>, vector<32x32xf32>
    %cst_33 = arith.constant dense<0.000000e+00> : vector<8x32xf32>
    %89 = tpu.matmul %87, %88, %cst_33 {dimension_numbers = #tpu.dot_dimension_numbers<[1], [0], [0], [1], [0, 0, 1, 1], [], []>} : vector<8x32xf32>, vector<32x32xf32>, vector<8x32xf32> -> vector<8x32xf32>
    %c0_34 = arith.constant 0 : index
    %c0_35 = arith.constant 0 : index
    %90 = vector.load %arg7[%c0_34, %c0_35] : memref<1x32xf32, #tpu.memory_space<vmem>>, vector<1x32xf32>
    %91 = vector.broadcast %90 : vector<1x32xf32> to vector<8x32xf32>
    %92 = arith.addf %89, %91 : vector<8x32xf32>
    %93 = arith.addf %25, %92 : vector<8x32xf32>
    %c0_36 = arith.constant 0 : index
    %c0_37 = arith.constant 0 : index
    %94 = vector.load %arg8[%c0_36, %c0_37] : memref<1x32xf32, #tpu.memory_space<vmem>>, vector<1x32xf32>
    %c0_38 = arith.constant 0 : index
    %c0_39 = arith.constant 0 : index
    %95 = vector.load %arg9[%c0_38, %c0_39] : memref<1x32xf32, #tpu.memory_space<vmem>>, vector<1x32xf32>
    %cst_40 = arith.constant dense<0.000000e+00> : vector<8xf32>
    %96 = vector.multi_reduction <add>, %93, %cst_40 [1] : vector<8x32xf32> to vector<8xf32>
    %97 = vector.shape_cast %96 : vector<8xf32> to vector<8x1xf32>
    %cst_41 = arith.constant 3.200000e+01 : f32
    %98 = vector.broadcast %cst_41 : f32 to vector<8x1xf32>
    %99 = arith.divf %97, %98 : vector<8x1xf32>
    %100 = vector.broadcast %99 : vector<8x1xf32> to vector<8x32xf32>
    %101 = arith.subf %93, %100 : vector<8x32xf32>
    %102 = arith.mulf %101, %101 : vector<8x32xf32>
    %cst_42 = arith.constant dense<0.000000e+00> : vector<8xf32>
    %103 = vector.multi_reduction <add>, %102, %cst_42 [1] : vector<8x32xf32> to vector<8xf32>
    %104 = vector.shape_cast %103 : vector<8xf32> to vector<8x1xf32>
    %cst_43 = arith.constant 3.200000e+01 : f32
    %105 = vector.broadcast %cst_43 : f32 to vector<8x1xf32>
    %106 = arith.divf %104, %105 : vector<8x1xf32>
    %107 = vector.broadcast %99 : vector<8x1xf32> to vector<8x32xf32>
    %108 = arith.subf %93, %107 : vector<8x32xf32>
    %cst_44 = arith.constant 9.99999974E-6 : f32
    %109 = vector.broadcast %cst_44 : f32 to vector<8x1xf32>
    %110 = arith.addf %106, %109 : vector<8x1xf32>
    %111 = math.rsqrt %110 : vector<8x1xf32>
    %112 = vector.broadcast %111 : vector<8x1xf32> to vector<8x32xf32>
    %113 = arith.mulf %108, %112 : vector<8x32xf32>
    %114 = vector.broadcast %94 : vector<1x32xf32> to vector<8x32xf32>
    %115 = arith.mulf %113, %114 : vector<8x32xf32>
    %116 = vector.broadcast %95 : vector<1x32xf32> to vector<8x32xf32>
    %117 = arith.addf %115, %116 : vector<8x32xf32>
    %c0_45 = arith.constant 0 : index
    %c0_46 = arith.constant 0 : index
    %118 = vector.load %arg10[%c0_45, %c0_46] : memref<32x96xf32, #tpu.memory_space<vmem>>, vector<32x96xf32>
    %cst_47 = arith.constant dense<0.000000e+00> : vector<8x96xf32>
    %119 = tpu.matmul %117, %118, %cst_47 {dimension_numbers = #tpu.dot_dimension_numbers<[1], [0], [0], [1], [0, 0, 1, 1], [], []>} : vector<8x32xf32>, vector<32x96xf32>, vector<8x96xf32> -> vector<8x96xf32>
    %c0_48 = arith.constant 0 : index
    %c0_49 = arith.constant 0 : index
    %120 = vector.load %arg11[%c0_48, %c0_49] : memref<1x96xf32, #tpu.memory_space<vmem>>, vector<1x96xf32>
    %121 = vector.broadcast %120 : vector<1x96xf32> to vector<8x96xf32>
    %122 = arith.addf %119, %121 : vector<8x96xf32>
    %cst_50 = arith.constant 0.000000e+00 : f32
    %123 = vector.broadcast %cst_50 : f32 to vector<8x96xf32>
    %124 = arith.maximumf %122, %123 : vector<8x96xf32>
    %c0_51 = arith.constant 0 : index
    %c0_52 = arith.constant 0 : index
    %125 = vector.load %arg12[%c0_51, %c0_52] : memref<96x32xf32, #tpu.memory_space<vmem>>, vector<96x32xf32>
    %cst_53 = arith.constant dense<0.000000e+00> : vector<8x32xf32>
    %126 = tpu.matmul %124, %125, %cst_53 {dimension_numbers = #tpu.dot_dimension_numbers<[1], [0], [0], [1], [0, 0, 1, 1], [], []>} : vector<8x96xf32>, vector<96x32xf32>, vector<8x32xf32> -> vector<8x32xf32>
    %c0_54 = arith.constant 0 : index
    %c0_55 = arith.constant 0 : index
    %127 = vector.load %arg13[%c0_54, %c0_55] : memref<1x32xf32, #tpu.memory_space<vmem>>, vector<1x32xf32>
    %128 = vector.broadcast %127 : vector<1x32xf32> to vector<8x32xf32>
    %129 = arith.addf %126, %128 : vector<8x32xf32>
    %130 = arith.addf %117, %129 : vector<8x32xf32>
    %c0_56 = arith.constant 0 : index
    %c0_57 = arith.constant 0 : index
    %c0_58 = arith.constant 0 : index
    %131 = vector.load %arg14[%c0_56, %c0_57, %c0_58] : memref<1x8x32xf32, #tpu.memory_space<vmem>>, vector<1x8x32xf32>
    %132 = vector.shape_cast %131 : vector<1x8x32xf32> to vector<8x32xf32>
    %133 = vector.shape_cast %130 : vector<8x32xf32> to vector<1x8x32xf32>
    tpu.vector_store %arg14[%c0_56, %c0_57, %c0_58], %133 {strides = array<i32>} : memref<1x8x32xf32, #tpu.memory_space<vmem>>, vector<1x8x32xf32>,
    return
  }
  func.func @transform_0(%arg0: i32) -> (i32, i32, i32) {
    %c0_i32 = arith.constant 0 : i32
    %c0_i32_0 = arith.constant 0 : i32
    %c0_i32_1 = arith.constant 0 : i32
    return %arg0, %c0_i32, %c0_i32_0 : i32, i32, i32
  }
  func.func @transform_1(%arg0: i32) -> (i32, i32) {
    %c0_i32 = arith.constant 0 : i32
    %c0_i32_0 = arith.constant 0 : i32
    %c0_i32_1 = arith.constant 0 : i32
    return %c0_i32, %c0_i32_0 : i32, i32
  }
  func.func @transform_2(%arg0: i32) -> (i32, i32) {
    %c0_i32 = arith.constant 0 : i32
    %c0_i32_0 = arith.constant 0 : i32
    %c0_i32_1 = arith.constant 0 : i32
    return %c0_i32, %c0_i32_0 : i32, i32
  }
  func.func @transform_3(%arg0: i32) -> (i32, i32) {
    %c0_i32 = arith.constant 0 : i32
    %c0_i32_0 = arith.constant 0 : i32
    %c0_i32_1 = arith.constant 0 : i32
    return %c0_i32, %c0_i32_0 : i32, i32
  }
  func.func @transform_4(%arg0: i32) -> (i32, i32) {
    %c0_i32 = arith.constant 0 : i32
    %c0_i32_0 = arith.constant 0 : i32
    %c0_i32_1 = arith.constant 0 : i32
    return %c0_i32, %c0_i32_0 : i32, i32
  }
  func.func @transform_5(%arg0: i32) -> (i32, i32) {
    %c0_i32 = arith.constant 0 : i32
    %c0_i32_0 = arith.constant 0 : i32
    %c0_i32_1 = arith.constant 0 : i32
    return %c0_i32, %c0_i32_0 : i32, i32
  }
  func.func @transform_6(%arg0: i32) -> (i32, i32) {
    %c0_i32 = arith.constant 0 : i32
    %c0_i32_0 = arith.constant 0 : i32
    %c0_i32_1 = arith.constant 0 : i32
    return %c0_i32, %c0_i32_0 : i32, i32
  }
  func.func @transform_7(%arg0: i32) -> (i32, i32) {
    %c0_i32 = arith.constant 0 : i32
    %c0_i32_0 = arith.constant 0 : i32
    %c0_i32_1 = arith.constant 0 : i32
    return %c0_i32, %c0_i32_0 : i32, i32
  }
  func.func @transform_8(%arg0: i32) -> (i32, i32) {
    %c0_i32 = arith.constant 0 : i32
    %c0_i32_0 = arith.constant 0 : i32
    %c0_i32_1 = arith.constant 0 : i32
    return %c0_i32, %c0_i32_0 : i32, i32
  }
  func.func @transform_9(%arg0: i32) -> (i32, i32) {
    %c0_i32 = arith.constant 0 : i32
    %c0_i32_0 = arith.constant 0 : i32
    %c0_i32_1 = arith.constant 0 : i32
    return %c0_i32, %c0_i32_0 : i32, i32
  }
  func.func @transform_10(%arg0: i32) -> (i32, i32) {
    %c0_i32 = arith.constant 0 : i32
    %c0_i32_0 = arith.constant 0 : i32
    %c0_i32_1 = arith.constant 0 : i32
    return %c0_i32, %c0_i32_0 : i32, i32
  }
  func.func @transform_11(%arg0: i32) -> (i32, i32) {
    %c0_i32 = arith.constant 0 : i32
    %c0_i32_0 = arith.constant 0 : i32
    %c0_i32_1 = arith.constant 0 : i32
    return %c0_i32, %c0_i32_0 : i32, i32
  }
  func.func @transform_12(%arg0: i32) -> (i32, i32) {
    %c0_i32 = arith.constant 0 : i32
    %c0_i32_0 = arith.constant 0 : i32
    %c0_i32_1 = arith.constant 0 : i32
    return %c0_i32, %c0_i32_0 : i32, i32
  }
  func.func @transform_13(%arg0: i32) -> (i32, i32, i32) {
    %c0_i32 = arith.constant 0 : i32
    %c0_i32_0 = arith.constant 0 : i32
    %c0_i32_1 = arith.constant 0 : i32
    return %arg0, %c0_i32, %c0_i32_0 : i32, i32, i32
  }
}

</mosaic_0001>

<bundles_post_ra>
// kernel: transformer_block.1
= control target key start
LH: loop header
LB: loop body
LE: loop exit
PB: predicated region body
PF: predicated region fallthrough
CT: control target
= control target key end

     0   :  { %s2328_s0 = inlined_call_operand.vmem [shape: f32[2,8,32], index: 0, kind: input, shape index: {}]   ;;  %s2329_s1 = inlined_call_operand.vmem [shape: f32[1,32], index: 1, kind: input, shape index: {}]   ;;  %s2330_s2 = inlined_call_operand.vmem [shape: f32[1,32], index: 2, kind: input, shape index: {}]   ;;  %s2331_s3 = inlined_call_operand.vmem [shape: f32[32,96], index: 3, kind: input, shape index: {}]   ;;  %s2332_s4 = inlined_call_operand.vmem [shape: f32[1,96], index: 4, kind: input, shape index: {}]   ;;  %s2333_s5 = inlined_call_operand.vmem [shape: f32[32,32], index: 5, kind: input, shape index: {}]   ;;  %s2334_s6 = inlined_call_operand.vmem [shape: f32[1,32], index: 6, kind: input, shape index: {}]   ;;  %s2335_s7 = inlined_call_operand.vmem [shape: f32[1,32], index: 7, kind: input, shape index: {}]   ;;  %s2336_s8 = inlined_call_operand.vmem [shape: f32[1,32], index: 8, kind: input, shape index: {}]   ;;  %s2337_s9 = inlined_call_operand.vmem [shape: f32[32,96], index: 9, kind: input, shape index: {}]   ;;  %s2338_s10 = inlined_call_operand.vmem [shape: f32[1,96], index: 10, kind: input, shape index: {}]   ;;  %s2339_s11 = inlined_call_operand.vmem [shape: f32[96,32], index: 11, kind: input, shape index: {}]   ;;  %s2340_s12 = inlined_call_operand.vmem [shape: f32[1,32], index: 12, kind: input, shape index: {}]   ;;  %s2341_s13 = inlined_call_operand.hbm [shape: f32[2,8,32], index: 13, kind: output, shape index: {}]  }
   0x1   :  { %2342 = sst [smem:[#allocation5_spill]] %s2328_s0 }
   0x2   :  { %2343 = sst [smem:[#allocation6_spill]] %s2329_s1 }
   0x3   :  { %2344 = sst [smem:[#allocation7_spill]] %s2330_s2 }
   0x4   :  { %18 = vsyncpa [#allocation3], 0 }
   0x5   :  { %20 = vsyncpa [#allocation3 + $0x1], 0  ;;  %s2038_s25 = smov 0   ;;  %s2040_s26 = smov 0  }
   0x6   :  { %s2042_s27 = smov 0   ;;  %s2044_s28 = smov 0  }
   0x7 LB: > { %s2059_s29 = sadd.s32 4294967295, %s1948_s28   ;;  %s1596_s30 = sadd.s32 4294967294, %s1948_s28   ;;  %s1948_s28 = sphi %s2044_s28, %s2353_s28   ;;  %s1944_s27 = sphi %s2042_s27, %s2352_s27   ;;  %s1940_s26 = sphi %s2040_s26, %s2351_s26   ;;  %s1936_s25 = sphi %s2038_s25, %s2350_s25  }
   0x8   : > { %s2063_s14 = sadd.s32 1, %s1948_s28   ;;  %s311_s15 = sadd.s32 1, %s1944_s27 }
   0x9   : > { %s308_s16 = ssub.s32 %s1948_s28, %s2063_s14  ;;  %p321_p0 = scmp.ne.s32.totalorder %s1944_s27, %s1940_s26 }
   0xa   : > { %p309_p1 = scmp.eq.s32.totalorder %s308_s16, 0  ;;  %p322_p2 = scmp.eq.s32.totalorder %s2059_s29, 1 }
   0xb   : > { %p327_p3 = scmp.ne.s32.totalorder %s1940_s26, %s1936_s25  ;;  %p328_p4 = scmp.eq.s32.totalorder %s1596_s30, 1 }
   0xc   : > { %s2074_s17 = scalar_select %p309_p1, %s1944_s27, %s311_s15  }
   0xd   : > { %p2076_p5 = por %p322_p2, %p321_p0  ;;  %p2080_p6 = por %p328_p4, %p327_p3 }
   0xe   : > { %p1599_p7 = scmp.ge.s32.totalorder %s1948_s28, 1  ;;  %p389_p8 = scmp.lt.s32.totalorder %s1948_s28, 3 }
  0x10   : > { %p390_p9 = pnand %p1599_p7, %p389_p8 }
  0x11   : > { %p432_p10 = scmp.lt.s32.totalorder (!%p390_p9), %s2059_s29, 1  ;;  %vm439_vm0 = vcmask (!%p390_p9), 261120   ;;  %s2347_s0 = sld [smem:[#allocation5_spill]] (!%p390_p9)  ;;  %v468_v7 = vld [vmem:[%s2331_s3] sm:$0xff] (!%p390_p9)  ;;  %v469_v8 = vld [vmem:[%s2331_s3 + $0x8] sm:$0xff] (!%p390_p9)  ;;  %v470_v9 = vld [vmem:[%s2331_s3 + $0x10] sm:$0xff] (!%p390_p9) }
  0x12   : > { %393 = sbr.rel (%p390_p9) target bundleno = 3042 (0xbe2), region = 72  ;;  %v1950_v10 = vmov (!%p390_p9), 0.0|0.0   ;;  %v1775_v11 = vpack.c.bf16 (!%p390_p9), %v469_v8, %v468_v7  ;;  %v471_v12 = vld [vmem:[%s2331_s3 + $0x18] sm:$0xff] (!%p390_p9)  ;;  %vm1951_vm1 = vmmov (!%p390_p9), 0   ;;  %v1952_v13 = vmov (!%p390_p9), 0.0   ;;  %s2348_s1 = sld [smem:[#allocation6_spill]] (!%p390_p9) }
  0x13   : > { %1774 = vmatprep.subr.bf16.mxu1 (!%p390_p9), %v1950_v10  ;;  %1682 = vmatprep.mubr.msk.f32.mxu1 (!%p390_p9), %vm1951_vm1, %v1952_v13  ;;  %v1778_v14 = vpack.c.bf16 (!%p390_p9), %v471_v12, %v470_v9  ;;  %s2349_s2 = sld [smem:[#allocation7_spill]] (!%p390_p9)  ;;  %v1604_v24 = vld [vmem:[%s2332_s4] ss:$0 sm:$0xff] (!%p390_p9)  ;;  %s1953_s23 = smov (!%p390_p9), 64   ;;  %vm555_vm2 = vcmask (!%p390_p9), 64512   ;;  %vm1225_vm3 = vcmask (!%p390_p9), 130048  }
  0x14   : > { %1705 = vmatprep.subr.mxu0 (!%p390_p9), %v1952_v13  ;;  %1707 = vmatprep.mubr.msk.f32.mxu0 (!%p390_p9), %vm1951_vm1, %v1952_v13  ;;  %s1955_s30 = smov (!%p390_p9), 88   ;;  %s1956_s15 = smov (!%p390_p9), 120   ;;  %vm1227_vm4 = vcmask (!%p390_p9), 195584   ;;  %vm1447_vm5 = vcmask (!%p390_p9), 785408  }
  0x15   : > { %1776 = vmatpush3.bf16.msra.mxu1 (!%p390_p9), %v1775_v11  ;;  %s1957_s16 = smov (!%p390_p9), 80   ;;  %s1960_s22 = smov (!%p390_p9), 104  }
  0x16   : > { %1777 = vmatprep.subr.bf16.mxu1 (!%p390_p9), %v1950_v10 }
  0x18   : > { %v1602_v19 = vld [vmem:[%s2348_s1] ss:$0 sm:$0xff] (!%p390_p9) }
  0x19   : > { %s433_s20 = scalar_select %p432_p10, %s2059_s29, 1  ;;  %1779 = vmatpush3.bf16.msra.mxu1 %v1778_v14  ;;  %v1603_v21 = vld [vmem:[%s2349_s2] ss:$0 sm:$0xff] }
  0x1a   : > { %1685 = vmatprep.subr.mxu1 %v1952_v13 }
  0x1b   : > { %s1601_s21 = sshll.u32 %s433_s20, 3  ;;  %s1958_s20 = smov 112  }
  0x1c   : > { %s435_s24 = scalar_lea.vmem %s2347_s0, %s1601_s21  ;;  %s1959_s21 = smov 72  }
  0x1d   : > { %v436_v0 = vld [vmem:[%s435_s24] sm:$0xff]  ;;  %s1954_s24 = smov 96  }
  0x1e   : > { %v440_v1 = vsel %vm439_vm0, %v436_v0, 0.0 }
  0x1f   : > { %441 = vadd.xlane.f32.xlu0 %v440_v1 }
  0xac   : > { %v442_v2 = vpop.xlane.xlu0 %441 }
  0xad   : > { %v444_v3 = vmul.f32 0.03125, %v442_v2 }
  0xaf   : > { %v445_v4 = vsub.f32 %v436_v0, %v444_v3 }
  0xb1   : > { %v446_v5 = vmul.f32 %v445_v4, %v445_v4 }
  0xb3   : > { %v447_v6 = vsel %vm439_vm0, %v446_v5, 0.0 }
  0xb4   : > { %448 = vadd.xlane.f32.xlu0 %v447_v6 }
 0x141   : > { %v449_v15 = vpop.xlane.xlu0 %448 }
 0x142   : > { %v450_v16 = vmul.f32 0.03125, %v449_v15 }
 0x144   : > { %v451_v17 = vadd.f32 1e-05, %v450_v16 }
 0x146   : > { %1866 = vrsqrt.f32 %v451_v17 }
 0x150   : > { %v1867_v18 = vpop.eup %1866 }
 0x151   : > { %v453_v20 = vmul.f32 %v1867_v18, %v445_v4 }
 0x153   : > { %v460_v22 = vmul.f32 %v1602_v19, %v453_v20 }
 0x155   : > { %v2119_v23 = vadd.f32 %v1603_v21, %v460_v22 }
 0x157   : > { %1683 = vmatmul.mubr.msk.f32.vlgmr.msra.gmra.mrb[0].mxu1 %vm439_vm0, %v2119_v23 }
 0x158   : > { %1687 = vmatprep.mubr.msk.f32.mxu1 %vm1951_vm1, %v1952_v13 }
 0x22a   : > { %v548_v25 = vpop.f32.mrb[0].mxu1 }
 0x22b   : > { %v2128_v26 = vadd.f32 %v1604_v24, %v548_v25  ;;  %v1684_v27 = vpop.f32.mrb[1].mxu1  ;;  %v1229_v24 = vld [vmem:[%s2333_s5] sm:$0xff]  ;;  %v1230_v25 = vld [vmem:[%s2333_s5 + $0x8] sm:$0xff] }
 0x22c   : > { %v1231_v27 = vld [vmem:[%s2333_s5 + $0x10] sm:$0xff] }
 0x22d   : > { %641 = vrot.lane.b32.xlu0 %v2128_v26, %s1953_s23  ;;  %553 = vrot.lane.b32.xlu1 %v2128_v26, %s1954_s24  ;;  %s1961_s23 = smov 48   ;;  %s1962_s24 = smov 56  }
 0x231   : > { %719 = vrot.lane.b32.xlu0 %v2128_v26, %s1955_s30  ;;  %s1963_s30 = smov 40  }
 0x235   : > { %717 = vrot.lane.b32.xlu0 %v2128_v26, %s1956_s15  ;;  %s1964_s15 = smov 8  }
 0x29f   : > { %v554_v28 = vpop.permute.xlu1 %553  ;;  %v642_v29 = vpop.permute.xlu0 %641 }
 0x2a0   : > { %1686 = vmatpush3.xpose.msk.msra.mxu1 %vm555_vm2, %v554_v28  ;;  %v1232_v28 = vld [vmem:[%s2333_s5 + $0x18] sm:$0xff] }
 0x2a1   : > { %1690 = vmatprep.subr.mxu1 %v1952_v13 }
 0x2a3   : > { %1688 = vmatmul.mubr.msk.f32.vlgmr.msra.gmra.mrb[2].mxu1 %vm555_vm2, %v2128_v26  ;;  %v720_v39 = vpop.permute.xlu0 %719 }
 0x2a4   : > { %1691 = vmatpush3.msra.mxu1 %v642_v29  ;;  %1692 = vmatprep.mubr.msk.f32.mxu1 %vm1951_vm1, %v1952_v13  ;;  %v1784_v29 = vpack.c.bf16 %v1232_v28, %v1231_v27  ;;  %v1624_v27 = vld [vmem:[%s2340_s12] ss:$0 sm:$0xff] }
 0x2a5   : > { %1695 = vmatprep.subr.mxu1 %v1952_v13 }
 0x2a7   : > { %v718_v40 = vpop.permute.xlu0 %717 }
 0x376   : > { %v626_v30 = vpop.f32.mrb[2].mxu1 }
 0x377   : > { %v1689_v31 = vpop.f32.mrb[3].mxu1  ;;  %v630_v32 = vsel %vm555_vm2, %v626_v30, -inf }
 0x378   : > { %631 = vmax.xlane.f32.xlu1 %v630_v32 }
 0x389   : > { %884 = vrot.lane.b32.xlu1 %v2128_v26, %s1957_s16  ;;  %s1965_s16 = smov 16  }
 0x405   : > { %v632_v33 = vpop.xlane.xlu1 %631 }
 0x406   : > { %v633_v34 = vsub.f32 %v626_v30, %v632_v33 }
 0x408   : > { %v634_v35 = vmul.f32 1.442695, %v633_v34 }
 0x409   : > { %v885_v36 = vpop.permute.xlu1 %884 }
 0x40a   : > { %1868 = vpow2.f32 %v634_v35  ;;  %1706 = vmatpush3.xpose.msk.msra.mxu0 %vm555_vm2, %v885_v36 }
 0x40b   : > { %1715 = vmatprep.subr.mxu0 %v1952_v13 }
 0x414   : > { %v1869_v37 = vpop.eup %1868 }
 0x415   : > { %v636_v38 = vsel %vm555_vm2, %v1869_v37, 0.0 }
 0x416   : > { %637 = vadd.xlane.f32.xlu0 %v636_v38 }
 0x42c   : > { %882 = vrot.lane.b32.xlu0 %v2128_v26, %s1958_s20  ;;  %s1966_s20 = smov 24  }
 0x430   : > { %1049 = vrot.lane.b32.xlu0 %v2128_v26, %s1959_s21 }
 0x434   : > { %1047 = vrot.lane.b32.xlu0 %v2128_v26, %s1960_s22 }
 0x4a3   : > { %v638_v41 = vpop.xlane.xlu0 %637 }
 0x4a4   : > { %1870 = vrcp.f32 %v638_v41 }
 0x4a7   : > { %v883_v42 = vpop.permute.xlu0 %882 }
 0x4a8   : > { %1708 = vmatmul.mubr.msk.f32.vlgmr.msra.gmra.mrb[0].mxu0 %vm555_vm2, %v883_v42  ;;  %v1618_v42 = vld [vmem:[%s2334_s6] ss:$0 sm:$0xff] }
 0x4a9   : > { %1717 = vmatprep.mubr.msk.f32.mxu0 %vm1951_vm1, %v1952_v13 }
 0x4ab   : > { %v1050_v43 = vpop.permute.xlu0 %1049 }
 0x4ac   : > { %1716 = vmatpush3.xpose.msk.msra.mxu0 %vm555_vm2, %v1050_v43 }
 0x4ad   : > { %1780 = vmatprep.subr.bf16.mxu0 %v1950_v10 }
 0x4ae   : > { %v1871_v44 = vpop.eup %1870 }
 0x4af   : > { %v640_v45 = vmul.f32 %v1871_v44, %v1869_v37  ;;  %v1048_v46 = vpop.permute.xlu0 %1047 }
 0x4b0   : > { %1718 = vmatmul.mubr.msk.f32.vlgmr.msra.gmra.mrb[2].mxu0 %vm555_vm2, %v1048_v46 }
 0x4b1   : > { %1693 = vmatmul.mubr.msk.f32.vlgmr.msra.gmra.mrb[4].mxu1 %vm555_vm2, %v640_v45  ;;  %1733 = vmatprep.mubr.msk.f32.mxu0 %vm1951_vm1, %v1952_v13 }
 0x4b2   : > { %1696 = vmatpush3.xpose.msk.msra.mxu1 %vm555_vm2, %v720_v39  ;;  %1697 = vmatprep.mubr.msk.f32.mxu1 %vm1951_vm1, %v1952_v13 }
 0x4b3   : > { %1700 = vmatprep.subr.mxu1 %v1952_v13 }
 0x4b5   : > { %1698 = vmatmul.mubr.msk.f32.vlgmr.msra.gmra.mrb[6].mxu1 %vm555_vm2, %v718_v40 }
 0x4b6   : > { %1702 = vmatprep.mubr.msk.f32.mxu1 %vm1951_vm1, %v1952_v13 }
 0x57b   : > { %v956_v47 = vpop.f32.mrb[0].mxu0 }
 0x57c   : > { %v1709_v48 = vpop.f32.mrb[1].mxu0  ;;  %v960_v49 = vsel %vm555_vm2, %v956_v47, -inf }
 0x57d   : > { %961 = vmax.xlane.f32.xlu1 %v960_v49 }
 0x583   : > { %v1121_v50 = vpop.f32.mrb[2].mxu0 }
 0x584   : > { %v2166_v51 = vpop.f32.mrb[4].mxu1  ;;  %v1719_v52 = vpop.f32.mrb[3].mxu0  ;;  %v1125_v57 = vsel %vm555_vm2, %v1121_v50, -inf }
 0x585   : > { %v1694_v53 = vpop.f32.mrb[5].mxu1 }
 0x586   : > { %v1344_v53 = vld [vmem:[%s2337_s9 + $0x8] sm:$0xff] }
 0x588   : > { %v791_v54 = vpop.f32.mrb[6].mxu1 }
 0x589   : > { %v1699_v55 = vpop.f32.mrb[7].mxu1  ;;  %v795_v56 = vsel %vm555_vm2, %v791_v54, -inf }
 0x58a   : > { %796 = vmax.xlane.f32.xlu0 %v795_v56  ;;  %v1346_v55 = vld [vmem:[%s2337_s9 + $0x18] sm:$0xff] }
 0x58e   : > { %1126 = vmax.xlane.f32.xlu0 %v1125_v57  ;;  %v1428_v57 = vld [vmem:[%s2339_s11] sm:$0xff] }
 0x60a   : > { %v962_v58 = vpop.xlane.xlu1 %961 }
 0x60b   : > { %v963_v59 = vsub.f32 %v956_v47, %v962_v58  ;;  %v1429_v58 = vld [vmem:[%s2339_s11 + $0x8] sm:$0xff] }
 0x60d   : > { %v964_v60 = vmul.f32 1.442695, %v963_v59  ;;  %v1430_v59 = vld [vmem:[%s2339_s11 + $0x10] sm:$0xff] }
 0x60f   : > { %1872 = vpow2.f32 %v964_v60  ;;  %v1793_v60 = vpack.c.bf16 %v1429_v58, %v1428_v57 }
 0x617   : > { %v797_v61 = vpop.xlane.xlu0 %796 }
 0x618   : > { %v798_v62 = vsub.f32 %v791_v54, %v797_v61  ;;  %v1431_v61 = vld [vmem:[%s2339_s11 + $0x18] sm:$0xff] }
 0x619   : > { %v1873_v63 = vpop.eup %1872 }
 0x61a   : > { %v799_v0 = vmul.f32 1.442695, %v798_v62  ;;  %v966_v1 = vsel %vm555_vm2, %v1873_v63, 0.0  ;;  %v1796_v62 = vpack.c.bf16 %v1431_v61, %v1430_v59 }
 0x61b   : > { %967 = vadd.xlane.f32.xlu0 %v966_v1  ;;  %v1127_v2 = vpop.xlane.xlu0 %1126 }
 0x61c   : > { %1874 = vpow2.f32 %v799_v0  ;;  %v1128_v3 = vsub.f32 %v1121_v50, %v1127_v2  ;;  %v1433_v0 = vld [vmem:[%s2339_s11 + $0x28] sm:$0xff]  ;;  %v1434_v2 = vld [vmem:[%s2339_s11 + $0x30] sm:$0xff] }
 0x61e   : > { %v1129_v4 = vmul.f32 1.442695, %v1128_v3  ;;  %v1435_v3 = vld [vmem:[%s2339_s11 + $0x38] sm:$0xff] }
 0x620   : > { %1876 = vpow2.f32 %v1129_v4  ;;  %v1802_v4 = vpack.c.bf16 %v1435_v3, %v1434_v2 }
 0x626   : > { %v1875_v5 = vpop.eup %1874 }
 0x627   : > { %v801_v6 = vsel %vm555_vm2, %v1875_v5, 0.0 }
 0x628   : > { %802 = vadd.xlane.f32.xlu0 %v801_v6  ;;  %v1437_v6 = vld [vmem:[%s2339_s11 + $0x48] sm:$0xff] }
 0x62a   : > { %v1877_v7 = vpop.eup %1876 }
 0x62b   : > { %v1131_v8 = vsel %vm555_vm2, %v1877_v7, 0.0 }
 0x62c   : > { %1132 = vadd.xlane.f32.xlu1 %v1131_v8 }
 0x63d   : > { %971 = vrot.lane.b32.xlu1 %v2128_v26, %s1961_s23  ;;  %s429_s23 = sand.u32 1, %s1940_s26  }
 0x63e   : > { %806 = vrot.lane.b32.xlu0 %v2128_v26, %s1962_s24  ;;  %s1600_s24 = sshll.u32 %s429_s23, 3  ;;  %s1524_s0 = scalar_lea.sflag [#allocation3], %s429_s23 }
 0x641   : > { %1136 = vrot.lane.b32.xlu1 %v2128_v26, %s1963_s30  ;;  %v1781_v26 = vpack.c.bf16 %v1230_v25, %v1229_v24  ;;  %s1627_s30 = sshll.u32 %s2059_s29, 7  ;;  %s1967_s29 = smov [#allocation2]  }
 0x642   : > { %s2285_s22 = scalar_lea.hbm %s2341_s13, %s1627_s30 }
 0x643   : > { %1782 = vmatpush3.bf16.msra.mxu0 %v1781_v26 }
 0x644   : > { %1783 = vmatprep.subr.bf16.mxu0 %v1950_v10 }
 0x647   : > { %1785 = vmatpush3.bf16.msra.mxu0 %v1784_v29 }
 0x648   : > { %1792 = vmatprep.subr.bf16.mxu0 %v1950_v10 }
 0x6a8   : > { %v968_v9 = vpop.xlane.xlu0 %967 }
 0x6b5   : > { %v803_v11 = vpop.xlane.xlu0 %802 }
 0x6b6   : > { %1878 = vrcp.f32 %v803_v11 }
 0x6b7   : > { %1880 = vrcp.f32 %v968_v9 }
 0x6b9   : > { %v1133_v12 = vpop.xlane.xlu1 %1132  ;;  %v807_v14 = vpop.permute.xlu0 %806 }
 0x6ba   : > { %1701 = vmatpush3.msra.mxu1 %v807_v14  ;;  %1882 = vrcp.f32 %v1133_v12  ;;  %v1620_v14 = vld [vmem:[%s2335_s7] ss:$0 sm:$0xff] }
 0x6bb   : > { %1710 = vmatprep.subr.mxu1 %v1952_v13 }
 0x6bd   : > { %v972_v17 = vpop.permute.xlu1 %971 }
 0x6c0   : > { %v1879_v15 = vpop.eup %1878 }
 0x6c1   : > { %v805_v16 = vmul.f32 %v1879_v15, %v1875_v5  ;;  %v1881_v18 = vpop.eup %1880  ;;  %v1137_v21 = vpop.permute.xlu1 %1136  ;;  %v1436_v5 = vld [vmem:[%s2339_s11 + $0x40] sm:$0xff] }
 0x6c2   : > { %v970_v19 = vmul.f32 %v1881_v18, %v1873_v63  ;;  %v1432_v63 = vld [vmem:[%s2339_s11 + $0x20] sm:$0xff] }
 0x6c3   : > { %1703 = vmatmul.mubr.msk.f32.vlgmr.msra.gmra.mrb[8].mxu1 %vm555_vm2, %v805_v16  ;;  %v1799_v1 = vpack.c.bf16 %v1433_v0, %v1432_v63  ;;  %v1621_v16 = vld [vmem:[%s2336_s8] ss:$0 sm:$0xff] }
 0x6c4   : > { %1711 = vmatpush3.msra.mxu1 %v972_v17  ;;  %1712 = vmatprep.mubr.msk.f32.mxu1 %vm1951_vm1, %v1952_v13  ;;  %v1883_v20 = vpop.eup %1882 }
 0x6c5   : > { %1720 = vmatprep.subr.mxu1 %v1952_v13  ;;  %v1135_v22 = vmul.f32 %v1883_v20, %v1877_v7  ;;  %v1805_v7 = vpack.c.bf16 %v1437_v6, %v1436_v5 }
 0x6c7   : > { %1713 = vmatmul.mubr.msk.f32.vlgmr.msra.gmra.mrb[10].mxu1 %vm555_vm2, %v970_v19  ;;  %v1439_v19 = vld [vmem:[%s2339_s11 + $0x58] sm:$0xff] }
 0x6c8   : > { %1721 = vmatpush3.msra.mxu1 %v1137_v21  ;;  %1722 = vmatprep.mubr.msk.f32.mxu1 %vm1951_vm1, %v1952_v13  ;;  %v1622_v21 = vld [vmem:[%s2338_s10] ss:$0 sm:$0xff] }
 0x6c9   : > { %1786 = vmatprep.subr.bf16.mxu1 %v1950_v10 }
 0x6cb   : > { %1723 = vmatmul.mubr.msk.f32.vlgmr.msra.gmra.mrb[12].mxu1 %vm555_vm2, %v1135_v22 }
 0x6cc   : > { %1744 = vmatprep.mubr.msk.f32.mxu1 %vm1951_vm1, %v1952_v13 }
 0x796   : > { %v878_v30 = vpop.f32.mrb[8].mxu1 }
 0x797   : > { %1213 = vrot.lane.b32.xlu1 %v878_v30, %s1964_s15  ;;  %v1704_v31 = vpop.f32.mrb[9].mxu1  ;;  %s431_s15 = scalar_lea.vmem [#allocation2], %s1600_s24  ;;  %s1890_s24 = sshll.u32 %s1967_s29, 4  ;;  %s1891_s24 = int_to_ptr.vmem [resolvable:$false] %s1890_s24 }
 0x798   : > { %s1892_s2 = scalar_lea.vmem %s1891_s24, 256 }
 0x79a   : > { %v1043_v32 = vpop.f32.mrb[10].mxu1 }
 0x79b   : > { %1217 = vrot.lane.b32.xlu0 %v1043_v32, %s1965_s16  ;;  %v1714_v33 = vpop.f32.mrb[11].mxu1  ;;  %s1537_s16 = sshll.u32 %s431_s15, 4  ;;  %s2287_s16 = int_to_ptr.vmem [resolvable:$true] %s1537_s16 }
 0x79c   : > { %s1886_s1 = scalar_lea.vmem %s2287_s16, 128  ;;  %p1893_p0 = scmp.lt.s32.totalorder %s2287_s16, %s1891_s24 }
 0x79d   : > { %p1887_p11 = scmp.ne.s32.totalorder %s2287_s16, %s1886_s1  ;;  %p1894_p1 = scmp.lt.s32.totalorder %s1892_s2, %s1886_s1 }
 0x79e   : > { %v1208_v34 = vpop.f32.mrb[12].mxu1 }
 0x79f   : > { %1221 = vrot.lane.b32.xlu1 %v1208_v34, %s1966_s20  ;;  %v1724_v35 = vpop.f32.mrb[13].mxu1  ;;  %p1888_p12 = pnand %p1887_p11, %p2076_p5  ;;  %p1895_p2 = por %p1894_p1, %p1893_p0 }
 0x7a1   : > { %p1889_p13 = pneg %p1888_p12 }
 0x7a3   : > { %p1896_p3 = pnand %p1895_p2, %p1889_p13 }
 0x809   : > { %v1214_v36 = vpop.permute.xlu1 %1213 }
 0x80a   : > { %v1224_v38 = vsel %vm555_vm2, %v2166_v51, %v1214_v36 }
 0x80d   : > { %v1218_v37 = vpop.permute.xlu0 %1217 }
 0x80e   : > { %v1226_v39 = vsel %vm1225_vm3, %v1224_v38, %v1218_v37 }
 0x811   : > { %v1222_v40 = vpop.permute.xlu1 %1221 }
 0x812   : > { %v1228_v41 = vsel %vm1227_vm4, %v1226_v39, %v1222_v40 }
 0x813   : > { %1734 = vmatmul.mubr.msk.f32.vlgmr.msra.gmra.mrb[4].mxu0 %vm439_vm0, %v1228_v41 }
 0x814   : > { %1771 = vmatprep.mubr.msk.f32.mxu0 %vm1951_vm1, %v1952_v13  ;;  %v1343_v13 = vld [vmem:[%s2337_s9] sm:$0xff]  ;;  %1794 = vmatpush3.bf16.msra.mxu0 %v1793_v60 }
 0x815   : > { %v1787_v54 = vpack.c.bf16 %v1344_v53, %v1343_v13  ;;  %1795 = vmatprep.subr.bf16.mxu0 %v1950_v10 }
 0x817   : > { %1788 = vmatpush3.bf16.msra.mxu1 %v1787_v54 }
 0x818   : > { %1789 = vmatprep.subr.bf16.mxu1 %v1950_v10  ;;  %1797 = vmatpush3.bf16.msra.mxu0 %v1796_v62 }
 0x819   : > { %1798 = vmatprep.subr.bf16.mxu0 %v1950_v10 }
 0x81c   : > { %1800 = vmatpush3.bf16.msra.mxu0 %v1799_v1 }
 0x81d   : > { %1801 = vmatprep.subr.bf16.mxu0 %v1950_v10 }
 0x820   : > { %1803 = vmatpush3.bf16.msra.mxu0 %v1802_v4 }
 0x821   : > { %1804 = vmatprep.subr.bf16.mxu0 %v1950_v10 }
 0x824   : > { %1806 = vmatpush3.bf16.msra.mxu0 %v1805_v7 }
 0x825   : > { %1807 = vmatprep.subr.bf16.mxu0 %v1950_v10  ;;  %v1438_v10 = vld [vmem:[%s2339_s11 + $0x50] sm:$0xff] }
 0x826   : > { %v1808_v20 = vpack.c.bf16 %v1439_v19, %v1438_v10 }
 0x828   : > { %1809 = vmatpush3.bf16.msra.mxu0 %v1808_v20 }
 0x8e6   : > { %v1309_v43 = vpop.f32.mrb[4].mxu0 }
 0x8e7   : > { %v1310_v44 = vadd.f32 %v1618_v42, %v1309_v43  ;;  %v1735_v45 = vpop.f32.mrb[5].mxu0 }
 0x8e9   : > { %v1313_v46 = vadd.f32 %v1310_v44, %v2119_v23  ;;  %v1345_v23 = vld [vmem:[%s2337_s9 + $0x10] sm:$0xff] }
 0x8ea   : > { %v1790_v56 = vpack.c.bf16 %v1346_v55, %v1345_v23 }
 0x8eb   : > { %v1316_v47 = vsel %vm439_vm0, %v1313_v46, 0.0 }
 0x8ec   : > { %1317 = vadd.xlane.f32.xlu0 %v1316_v47  ;;  %1791 = vmatpush3.bf16.msra.mxu1 %v1790_v56 }
 0x979   : > { %v1318_v48 = vpop.xlane.xlu0 %1317 }
 0x97a   : > { %v1319_v49 = vmul.f32 0.03125, %v1318_v48 }
 0x97c   : > { %v1320_v50 = vsub.f32 %v1313_v46, %v1319_v49 }
 0x97e   : > { %v1321_v51 = vmul.f32 %v1320_v50, %v1320_v50 }
 0x980   : > { %v1322_v52 = vsel %vm439_vm0, %v1321_v51, 0.0 }
 0x981   : > { %1323 = vadd.xlane.f32.xlu1 %v1322_v52 }
 0xa0e   : > { %v1324_v8 = vpop.xlane.xlu1 %1323 }
 0xa0f   : > { %v1325_v9 = vmul.f32 0.03125, %v1324_v8 }
 0xa11   : > { %v1326_v11 = vadd.f32 1e-05, %v1325_v9 }
 0xa13   : > { %1884 = vrsqrt.f32 %v1326_v11 }
 0xa1d   : > { %v1885_v12 = vpop.eup %1884 }
 0xa1e   : > { %v1328_v15 = vmul.f32 %v1885_v12, %v1320_v50 }
 0xa20   : > { %v1335_v17 = vmul.f32 %v1620_v14, %v1328_v15 }
 0xa22   : > { %v1342_v18 = vadd.f32 %v1621_v16, %v1335_v17 }
 0xa24   : > { %1745 = vmatmul.mubr.msk.f32.vlgmr.msra.gmra.mrb[14].mxu1 %vm439_vm0, %v1342_v18 }
 0xaf7   : > { %v1423_v22 = vpop.f32.mrb[14].mxu1 }
 0xaf8   : > { %v1424_v24 = vadd.f32 %v1622_v21, %v1423_v22  ;;  %v1746_v25 = vpop.f32.mrb[15].mxu1 }
 0xafa   : > { %v1427_v26 = vmax.f32 %v1424_v24, 0.0 }
 0xafc   : > { %1772 = vmatmul.mubr.msk.f32.vlgmr.msra.gmra.mrb[6].mxu0 %vm1447_vm5, %v1427_v26 }
 0xbcf   : > { %v1517_v28 = vpop.f32.mrb[6].mxu0 }
 0xbd0   : > { %v1518_v29 = vadd.f32 %v1624_v27, %v1517_v28  ;;  %v1773_v30 = vpop.f32.mrb[7].mxu0 }
 0xbd2   : > { %v1521_v31 = vadd.f32 %v1518_v29, %v1342_v18 }
 0xbd4   : > { %1522 = vst.msk [vmem:[%s431_s15] sm:$0xff] %vm439_vm0, %v1521_v31 }
 0xbd5   : > { %1899 = shalt.err (!%p1896_p3)
}
 0xbd6   : > { %s1900_s23 = scalar_lea.hbm %s2285_s22, 128  ;;  %s1904_s20 = scalar_lea.hbm %s2341_s13, 256 }
 0xbd7   : > { %p1901_p4 = scmp.ne.s32.totalorder %s2285_s22, %s1900_s23  ;;  %p1905_p9 = scmp.lt.u32.totalorder %s2285_s22, %s2341_s13 }
 0xbd8   : > { %p1906_p10 = scmp.lt.u32.totalorder %s1904_s20, %s1900_s23  ;;  %p1908_p12 = scmp.lt.u32.totalorder %s1900_s23, %s2285_s22 }
 0xbd9   : > { %p1902_p7 = pnand %p1901_p4, %p2076_p5 }
 0xbda   : > { %p1907_p11 = por %p1906_p10, %p1905_p9 }
 0xbdb   : > { %p1903_p8 = pneg %p1902_p7 }
 0xbdc   : > { %p1909_p13 = por %p1908_p12, %p1907_p11 }
 0xbde   : > { %p1910_p0 = pnand %p1909_p13, %p1903_p8 }
 0xbe0   : > { %1913 = shalt.err (!%p1910_p0)
}
 0xbe1   : > { %1810 = dma.vmem_to_hbm [thread:$0]  (%p2076_p5), %s2287_s16, 128, %s2285_s22, %s1524_s0  }
 0xbe2 PF: > { %p1816_p1 = scmp.ge.s32.totalorder %s1948_s28, 2  ;;  %s1549_s2 = sand.u32 1, %s1936_s25  }
 0xbe3   : > { %s1550_s1 = scalar_lea.sflag [#allocation3], %s1549_s2 }
 0xbe4   : > { %p1813_p2 = pnand %p1816_p1, %p2080_p6 }
 0xbe6   : > { %1931 = dma.done.wait (!%p1813_p2), %s1550_s1, 128  }
 0xbe7   : > { %1933 = vsyncadd (!%p1813_p2), %s1550_s1, 4294967168  ;;  %p23_p3 = scmp.ge.s32.totalorder %s2063_s14, 4   ;;  %s2350_s25 = smov %s1940_s26 }
 0xbe8   : > { %s2351_s26 = smov %s1944_s27  ;;  %s2352_s27 = smov %s2074_s17 }
 0xbe9   : > { %s2353_s28 = smov %s2063_s14  ;;  %25 = sbr.rel (!%p23_p3) target bundleno = 7 (0x7), region = 107 }
 0xbf0   :  { %1555 = vsyncpa [#allocation3], 1 }
 0xbf1   :  { %1557 = vsyncpa [#allocation3 + $0x1], 1 }

</bundles_post_ra>
